<compile_context>
chip_gen: v7x
topology: tpu7x:2x2x1
jax: 0.10.0
libtpu: 0.0.40
codegen_flags: <defaults>
</compile_context>

<pallas_src>
import functools
import math

import jax
import jax.numpy as jnp
from jax.experimental import pallas as pl
from jax.experimental.pallas import tpu as pltpu


# ~2 MiB per array per block (fused: 3 arrays x 2 buffers x 2 MiB = 12 MiB,
# inside every generation's scoped-VMEM default, so no vmem_limit override).
_TARGET_BLOCK_BYTES = 2 * 1024 * 1024


def _sd_kernel(scale_ref, x_ref, o_ref):
    """out = x * scale[b]  (per-sample scale broadcast along the flat axis)."""
    o_ref[...] = (x_ref[...] * scale_ref[...]).astype(o_ref.dtype)


def _sd_residual_kernel(scale_ref, x_ref, r_ref, o_ref):
    """out = x * scale[b] + residual  (fused MBConvN skip connection)."""
    o_ref[...] = (x_ref[...] * scale_ref[...] + r_ref[...]).astype(o_ref.dtype)


def _block_cols(n, batch, itemsize):
    """Lane-dense column tile for the flattened (B, n) view."""
    if n <= 128:
        return n  # full-dim block satisfies the (8,128) rule by equality
    # Cap at ~half the flat axis so the (single, "parallel") grid axis always
    # has >= 2 blocks and v7x can shard the sweep across both TensorCores.
    half = pl.cdiv(pl.cdiv(n, 2), 128) * 128
    # ~2 MiB per array per block (all B samples live in one block).
    cap = max(128, (_TARGET_BLOCK_BYTES // (batch * itemsize)) // 128 * 128)
    return max(128, min(half, cap))


def _keep_scale(key, batch, survival_prob, dtype):
    """Per-sample scale: (rand < p) / p  (matches torch semantics)."""
    u = jax.random.uniform(key, (batch,), dtype=jnp.float32)
    keep = (u < survival_prob).astype(jnp.float32)
    scale = keep / jnp.float32(survival_prob)
    # bf16 activations multiply in bf16 (v6e/v7x bf16 VALU); otherwise f32.
    scale_dtype = jnp.bfloat16 if dtype == jnp.dtype(jnp.bfloat16) else jnp.float32
    return scale.astype(scale_dtype).reshape(batch, 1)


def _run(x, scale, residual=None):
    orig_shape = x.shape
    B = orig_shape[0]
    n = math.prod(orig_shape[1:])
    x2 = x.reshape(B, n)  # free reshape for contiguous NCHW
    inputs = [x2]
    if residual is not None:
        inputs.append(residual.reshape(B, n))

    itemsize = jnp.dtype(x.dtype).itemsize
    tn = _block_cols(n, B, itemsize)
    grid = (pl.cdiv(n, tn),)

    # Block covers all B samples; boundary block along the flat axis (when n is
    # not a multiple of tn) is masked on writeback by Pallas, so garbage read
    # in the padding region is never stored.
    data_spec = pl.BlockSpec((B, tn), lambda j: (0, j))
    scale_spec = pl.BlockSpec((B, 1), lambda j: (0, 0))

    kernel = _sd_kernel if residual is None else _sd_residual_kernel

    n_arrays = len(inputs) + 1  # big inputs + output
    cost = pl.CostEstimate(
        flops=(1 if residual is None else 2) * B * n,
        transcendentals=0,
        bytes_accessed=n_arrays * B * n * itemsize
        + scale.size * jnp.dtype(scale.dtype).itemsize,
    )

    out2 = pl.pallas_call(
        kernel,
        out_shape=jax.ShapeDtypeStruct((B, n), x.dtype),
        grid_spec=pltpu.PrefetchScalarGridSpec(
            num_scalar_prefetch=0,
            grid=grid,
            in_specs=[scale_spec] + [data_spec] * len(inputs),
            out_specs=data_spec,
        ),
        compiler_params=pltpu.CompilerParams(
            dimension_semantics=("parallel",),
        ),
        cost_estimate=cost,
    )(scale, *inputs)

    return out2.reshape(orig_shape)


@functools.partial(jax.jit, static_argnames=("survival_prob", "training"))
def stochastic_depth(x, key, *, survival_prob=0.8, training=True):
    """StochasticDepth.forward: (x / p) * (rand(B,1,1,1) < p); identity in eval."""
    if not training:
        return x
    scale = _keep_scale(key, x.shape[0], survival_prob, x.dtype)
    return _run(x, scale)


@functools.partial(jax.jit, static_argnames=("survival_prob", "training"))
def stochastic_depth_add(x, residual, key, *, survival_prob=0.8, training=True):
    """Fused MBConvN skip path: StochasticDepth(x) + residual."""
    if not training:
        return x + residual
    scale = _keep_scale(key, x.shape[0], survival_prob, x.dtype)
    return _run(x, scale, residual=residual)


def _check_case(shape, kx, kr, kmask, p):
    x = jax.random.normal(kx, shape, dtype=jnp.float32)
    residual = jax.random.normal(kr, shape, dtype=jnp.float32)
    B = shape[0]

    # Reference keep mask (same RNG draw as the kernels).
    u = jax.random.uniform(kmask, (B,), dtype=jnp.float32)
    keep = (u < p).astype(jnp.float32).reshape((B,) + (1,) * (len(shape) - 1))

    # Standalone stochastic depth (training).
    out = jax.block_until_ready(
        stochastic_depth(x, kmask, survival_prob=p, training=True))
    ref = (x / p) * keep
    assert jnp.allclose(out, ref, atol=1e-6, rtol=1e-6), f"sd mismatch {shape}"

    # Fused stochastic depth + residual add (MBConvN skip path, training).
    out_f = jax.block_until_ready(
        stochastic_depth_add(x, residual, kmask, survival_prob=p, training=True))
    ref_f = (x / p) * keep + residual
    assert jnp.allclose(out_f, ref_f, atol=1e-6, rtol=1e-6), f"fused mismatch {shape}"

    # Eval-mode paths (identity / plain add).
    out_eval = jax.block_until_ready(
        stochastic_depth(x, kmask, survival_prob=p, training=False))
    assert jnp.array_equal(out_eval, x)
    out_eval_f = jax.block_until_ready(
        stochastic_depth_add(x, residual, kmask, survival_prob=p, training=False))
    assert jnp.allclose(out_eval_f, x + residual, atol=1e-6, rtol=1e-6)


if __name__ == "__main__":
    key = jax.random.PRNGKey(0)
    kx, kr, kmask = jax.random.split(key, 3)
    p = 0.8

    # 128-aligned flat axis (n = 4*16*16 = 1024).
    _check_case((2, 4, 16, 16), kx, kr, kmask, p)
    # Ragged flat axis (n = 5*7*7 = 245): exercises masked boundary block.
    _check_case((2, 5, 7, 7), kx, kr, kmask, p)
    # Tiny flat axis (n = 3*5*5 = 75 < 128): full-dim lane block.
    _check_case((2, 3, 5, 5), kx, kr, kmask, p)

    print("KERNEL_OK")
</pallas_src>

<mosaic_0001>
module attributes {stable_mosaic.version = 11 : i64} {
  func.func @_sd_kernel(%arg0: i32, %arg1: memref<2x1xf32, #tpu.memory_space<vmem>>, %arg2: memref<2x512xf32, #tpu.memory_space<vmem>>, %arg3: memref<2x512xf32, #tpu.memory_space<vmem>>) attributes {dimension_semantics = [#tpu.dimension_semantics<parallel>], iteration_bounds = array<i64: 2>, scalar_prefetch = 0 : i64, scratch_operands = 0 : i64, tpu.core_type = #tpu.core_type<tc>, window_params = [{pipeline_mode = #tpu.pipeline_mode<synchronous>, transform_indices = @transform_0, window_bounds = array<i64: 2, 1>}, {transform_indices = @transform_1, window_bounds = array<i64: 2, 512>}, {transform_indices = @transform_2, window_bounds = array<i64: 2, 512>}]} {
    %c0 = arith.constant 0 : index
    %c0_0 = arith.constant 0 : index
    %0 = vector.load %arg2[%c0, %c0_0] : memref<2x512xf32, #tpu.memory_space<vmem>>, vector<2x512xf32>
    %c0_1 = arith.constant 0 : index
    %c0_2 = arith.constant 0 : index
    %1 = vector.load %arg1[%c0_1, %c0_2] : memref<2x1xf32, #tpu.memory_space<vmem>>, vector<2x1xf32>
    %2 = vector.broadcast %1 : vector<2x1xf32> to vector<2x512xf32>
    %3 = arith.mulf %0, %2 : vector<2x512xf32>
    %c0_3 = arith.constant 0 : index
    %c0_4 = arith.constant 0 : index
    %4 = vector.load %arg3[%c0_3, %c0_4] : memref<2x512xf32, #tpu.memory_space<vmem>>, vector<2x512xf32>
    tpu.vector_store %arg3[%c0_3, %c0_4], %3 {strides = array<i32>} : memref<2x512xf32, #tpu.memory_space<vmem>>, vector<2x512xf32>,
    return
  }
  func.func @transform_0(%arg0: i32) -> (i32, i32) {
    %c0_i32 = arith.constant 0 : i32
    %c0_i32_0 = arith.constant 0 : i32
    %c0_i32_1 = arith.constant 0 : i32
    return %c0_i32, %c0_i32_0 : i32, i32
  }
  func.func @transform_1(%arg0: i32) -> (i32, i32) {
    %c0_i32 = arith.constant 0 : i32
    %c0_i32_0 = arith.constant 0 : i32
    return %c0_i32, %arg0 : i32, i32
  }
  func.func @transform_2(%arg0: i32) -> (i32, i32) {
    %c0_i32 = arith.constant 0 : i32
    %c0_i32_0 = arith.constant 0 : i32
    return %c0_i32, %arg0 : i32, i32
  }
}

</mosaic_0001>

<bundles_post_ra>
// kernel: stochastic_depth.1
= control target key start
LH: loop header
LB: loop body
LE: loop exit
PB: predicated region body
PF: predicated region fallthrough
CT: control target
= control target key end

     0   :  { %s266_s9 = smov 0   ;;  %s286_s0 = inlined_call_operand.vmem [shape: f32[2,1], index: 0, kind: input, shape index: {}]   ;;  %s287_s1 = inlined_call_operand.vmem [shape: f32[2,1024], index: 1, kind: input, shape index: {}]   ;;  %s288_s2 = inlined_call_operand.vmem [shape: f32[2,1024], index: 2, kind: output, shape index: {}]  }
   0x1 LB: > { %s219_s10 = sadd.s32 4294967295, %s247_s9   ;;  %p223_p0 = scmp.ge.s32.totalorder %s247_s9, 1  ;;  %s247_s9 = sphi %s266_s9, %s12_s9  }
   0x2   : > { %p113_p1 = scmp.lt.s32.totalorder %s247_s9, 3 }
   0x4   : > { %p114_p2 = pnand %p223_p0, %p113_p1 }
   0x5   : > { %v148_v0 = vld [vmem:[%s286_s0] sm:$0x3] (!%p114_p2)  ;;  %v249_v1 = vmov (!%p114_p2), 0   ;;  %s224_s13 = sshll.u32 (!%p114_p2), %s219_s10, 2  ;;  %v250_v2 = vmov (!%p114_p2), 269488144   ;;  %v156_v4 = vlaneseq (!%p114_p2) }
   0x6   : > { %117 = sbr.rel (%p114_p2) target bundleno = 140 (0x8c), region = 28  ;;  %240 = vset.pattern.permute.xlu0 (!%p114_p2), %v249_v1  ;;  %p136_p3 = scmp.lt.s32.totalorder (!%p114_p2), %s224_s13, 7  ;;  %v154_v3 = vunpack.c.l.s4 (!%p114_p2), %v250_v2 }
   0x7   : > { %151 = vperm.xlu0 (!%p114_p2), %240, %v148_v0   ;;  %v157_v6 = vshrl.u32 (!%p114_p2), %v156_v4, 7 }
   0x8   : > { %v155_v5 = vunpack.c.0.s8 (!%p114_p2), %v154_v3 }
   0xa   : > { %v158_v7 = vsub.s32 (!%p114_p2), %v155_v5, %v157_v6 }
   0xd   : > { %s290_s13 = smov (!%p136_p3, %s224_s13), 7 }
   0xe   : > { %s225_s14 = sshll.u32 %s290_s13, 1 }
   0xf   : > { %s139_s17 = scalar_lea.vmem %s287_s1, %s225_s14  ;;  %s145_s20 = scalar_lea.vmem %s288_s2, %s225_s14 }
  0x10   : > { %v147_v9 = vld [vmem:[%s139_s17] sm:$0xff] }
  0x86   : > { %v152_v8 = vpop.permute.xlu0 %151 }
  0x87   : > { %v159_v10 = vrot.slane %v152_v8, %v158_v7 }
  0x89   : > { %v161_v11 = vmul.f32 %v159_v10, %v147_v9 }
  0x8b   : > { %162 = vst [vmem:[%s145_s20] sm:$0xff] %v161_v11 }
  0x8c PF: > { %s12_s9 = sadd.s32 1, %s247_s9  }
  0x8d   : > { %p9_p4 = scmp.ge.s32.totalorder %s12_s9, 4  }
  0x8f   :  { %11 = sbr.rel (!%p9_p4) target bundleno = 1 (0x1), region = 58 }

</bundles_post_ra>
